<compile_context>
chip_gen: v7x
topology: tpu7x:2x2x1
jax: 0.10.0
libtpu: 0.0.40
codegen_flags: <defaults>
</compile_context>

<pallas_src>
import jax
import jax.numpy as jnp
from jax.experimental import pallas as pl
from jax.experimental.pallas import tpu as pltpu


def _round_up(v: int, m: int) -> int:
    return ((v + m - 1) // m) * m


def classifier_mlp_kernel(x_ref, w_ref, b_ref, o_ref):
    """One batch tile: logits = x @ W + b, softmax over the last dim.

    Padded N lanes carry bias = -1e30 (set on the host), so exp() maps them
    to exactly 0 and they drop out of the max / sum -- no per-step mask.
    """
    logits = jnp.dot(x_ref[...], w_ref[...],
                     preferred_element_type=jnp.float32)
    logits = logits + b_ref[...]  # [1, N_pad] f32 broadcast (pad lanes -1e30)

    # Numerically stable softmax over dim=1, all math in f32.
    m = jnp.max(logits, axis=-1, keepdims=True)
    e = jnp.exp(logits - m)
    denom = jnp.sum(e, axis=-1, keepdims=True)
    # Exact division keeps row sums == 1 to f32 precision (the approx
    # reciprocal previously broke the 1e-3 row-sum check); denom is [TM, 1].
    o_ref[...] = (e / denom).astype(o_ref.dtype)


def _block_spec(block_shape, index_map, buffers=None):
    """BlockSpec, optionally with an explicit buffer count when supported."""
    if buffers is not None and hasattr(pl, "Buffered"):
        try:
            return pl.BlockSpec(block_shape, index_map,
                                pipeline_mode=pl.Buffered(buffers))
        except TypeError:
            pass  # older BlockSpec without pipeline_mode -> default buffering
    return pl.BlockSpec(block_shape, index_map)


def classifier_mlp(x, w, b, *, tm=512):
    """x: [B, input_dim] f32, w: [input_dim, out_dim] f32, b: [out_dim] f32.

    Returns softmax(x @ w + b, axis=1) as [B, out_dim] f32.
    """
    B, K = x.shape
    K_w, N = w.shape
    assert K == K_w and b.shape == (N,)

    # Lane-dense padding targets (skipped below when already aligned).
    K_pad = _round_up(K, 128)
    N_pad = _round_up(N, 128)

    B8 = _round_up(B, 8)
    TM = min(_round_up(tm, 8), B8)
    # v7x has 2 TensorCores: keep >= 2 grid steps when the batch allows it.
    if B8 // TM < 2 and B8 >= 16:
        TM = _round_up((B8 + 1) // 2, 8)
    B_pad = _round_up(B, TM)

    # bf16 MXU inputs (f32 accumulation in-kernel).  Skip the host-side
    # zero-pad copy when shapes are already aligned -- it doubles HBM traffic
    # on a mem-bound op.  K is a reduction dim, so when K % 128 != 0 the pad
    # MUST be zero-filled.
    if (B_pad, K_pad) == (B, K):
        x_p = x.astype(jnp.bfloat16)
    else:
        x_p = jnp.zeros((B_pad, K_pad), jnp.bfloat16).at[:B, :K].set(
            x.astype(jnp.bfloat16))
    if (K_pad, N_pad) == (K, N):
        w_p = w.astype(jnp.bfloat16)
    else:
        w_p = jnp.zeros((K_pad, N_pad), jnp.bfloat16).at[:K, :N].set(
            w.astype(jnp.bfloat16))
    if N_pad == N:
        b_p = b.astype(jnp.float32).reshape(1, N)
    else:
        # Mask lives in the resident bias: padded logit columns get -1e30
        # (W pad columns are zero), so exp() makes them exactly 0.
        b_p = jnp.full((1, N_pad), -1e30, jnp.float32).at[0, :N].set(
            b.astype(jnp.float32))

    grid = (B_pad // TM,)

    # Explicit scoped-VMEM budget: pipelined x/out tiles + resident W + bias
    # (W counted double-buffered to stay conservative) + compiler headroom.
    vmem_bytes = (2 * TM * K_pad * 2        # x tiles, bf16, double-buffered
                  + 2 * TM * N_pad * 4      # out tiles, f32, double-buffered
                  + 2 * K_pad * N_pad * 2   # resident W, bf16
                  + 2 * N_pad * 4           # bias, f32
                  + (4 << 20))              # headroom / internal scratch
    vmem_bytes = min(max(vmem_bytes, 16 << 20), 100 << 20)

    cost = pl.CostEstimate(
        flops=2 * B * K * N,
        transcendentals=B * N,
        bytes_accessed=(2 * (B_pad * K_pad + K_pad * N_pad)
                        + 4 * (N_pad + B_pad * N_pad)),
    )

    # TODO(synk): for large classifier heads (K_pad*N_pad bf16 approaching the
    # scoped VMEM limit, earliest on v7x), tile W over an extra N grid axis
    # with an online/two-pass softmax instead of keeping W fully resident.
    out_padded = pl.pallas_call(
        classifier_mlp_kernel,
        out_shape=jax.ShapeDtypeStruct((B_pad, N_pad), jnp.float32),
        grid_spec=pltpu.PrefetchScalarGridSpec(
            num_scalar_prefetch=0,
            grid=grid,  # batch tiles: pipelined, 2-TC parallel on v7x
            in_specs=[
                _block_spec((TM, K_pad), lambda i: (i, 0)),             # x
                _block_spec((K_pad, N_pad), lambda i: (0, 0), buffers=1),  # W
                _block_spec((1, N_pad), lambda i: (0, 0), buffers=1),      # b
            ],
            out_specs=pl.BlockSpec((TM, N_pad), lambda i: (i, 0)),
        ),
        compiler_params=pltpu.CompilerParams(
            dimension_semantics=("parallel",),
            vmem_limit_bytes=vmem_bytes,
        ),
        cost_estimate=cost,
    )(x_p, w_p, b_p)

    if (B_pad, N_pad) == (B, N):
        return out_padded
    return out_padded[:B, :N]


def reference(x, w, b):
    return jax.nn.softmax(x @ w + b, axis=1)


if __name__ == "__main__":
    key = jax.random.PRNGKey(0)
    k_x, k_w, k_b = jax.random.split(key, 3)

    batch = 8
    input_dim = 32   # feature dim fed to the classifier head
    out_dim = 10     # CIFAR-10 classes

    x = jax.random.normal(k_x, (batch, input_dim), dtype=jnp.float32)
    # PyTorch nn.Linear stores weight as [out_dim, input_dim]; the kernel
    # takes the transposed [input_dim, out_dim] layout for x @ W.
    w = jax.random.normal(k_w, (input_dim, out_dim), dtype=jnp.float32) * 0.1
    b = jax.random.normal(k_b, (out_dim,), dtype=jnp.float32) * 0.1

    out = jax.block_until_ready(classifier_mlp(x, w, b))
    ref = reference(x, w, b)

    assert out.shape == (batch, out_dim)
    # bf16 MXU inputs -> ~1e-2 tolerance on probabilities vs f32 reference.
    assert jnp.allclose(out, ref, atol=1e-2, rtol=1e-2), "mismatch vs reference"
    # Exact f32 division -> rows sum to 1 to f32 precision.
    assert jnp.allclose(jnp.sum(out, axis=1), jnp.ones((batch,)), atol=1e-3)

    print("KERNEL_OK")
</pallas_src>

<mosaic_0001>
module attributes {stable_mosaic.version = 11 : i64} {
  func.func @classifier_mlp_kernel(%arg0: i32, %arg1: memref<8x128xbf16, #tpu.memory_space<vmem>>, %arg2: memref<128x128xbf16, #tpu.memory_space<vmem>>, %arg3: memref<1x128xf32, #tpu.memory_space<vmem>>, %arg4: memref<8x128xf32, #tpu.memory_space<vmem>>) attributes {dimension_semantics = [#tpu.dimension_semantics<parallel>], iteration_bounds = array<i64: 1>, scalar_prefetch = 0 : i64, scratch_operands = 0 : i64, tpu.core_type = #tpu.core_type<tc>, window_params = [{transform_indices = @transform_0, window_bounds = array<i64: 8, 128>}, {pipeline_mode = #tpu.pipeline_mode<synchronous>, transform_indices = @transform_1, window_bounds = array<i64: 128, 128>}, {pipeline_mode = #tpu.pipeline_mode<synchronous>, transform_indices = @transform_2, window_bounds = array<i64: 1, 128>}, {transform_indices = @transform_3, window_bounds = array<i64: 8, 128>}]} {
    %c0 = arith.constant 0 : index
    %c0_0 = arith.constant 0 : index
    %0 = vector.load %arg1[%c0, %c0_0] : memref<8x128xbf16, #tpu.memory_space<vmem>>, vector<8x128xbf16>
    %c0_1 = arith.constant 0 : index
    %c0_2 = arith.constant 0 : index
    %1 = vector.load %arg2[%c0_1, %c0_2] : memref<128x128xbf16, #tpu.memory_space<vmem>>, vector<128x128xbf16>
    %cst = arith.constant dense<0.000000e+00> : vector<8x128xf32>
    %2 = tpu.matmul %0, %1, %cst {dimension_numbers = #tpu.dot_dimension_numbers<[1], [0], [0], [1], [0, 0, 1, 1], [], []>} : vector<8x128xbf16>, vector<128x128xbf16>, vector<8x128xf32> -> vector<8x128xf32>
    %c0_3 = arith.constant 0 : index
    %c0_4 = arith.constant 0 : index
    %3 = vector.load %arg3[%c0_3, %c0_4] : memref<1x128xf32, #tpu.memory_space<vmem>>, vector<1x128xf32>
    %4 = vector.broadcast %3 : vector<1x128xf32> to vector<8x128xf32>
    %5 = arith.addf %2, %4 : vector<8x128xf32>
    %cst_5 = arith.constant dense<0xFF800000> : vector<8xf32>
    %6 = vector.multi_reduction <maximumf>, %5, %cst_5 [1] : vector<8x128xf32> to vector<8xf32>
    %7 = vector.shape_cast %6 : vector<8xf32> to vector<8x1xf32>
    %8 = vector.broadcast %7 : vector<8x1xf32> to vector<8x128xf32>
    %9 = arith.subf %5, %8 : vector<8x128xf32>
    %10 = math.exp %9 : vector<8x128xf32>
    %cst_6 = arith.constant dense<0.000000e+00> : vector<8xf32>
    %11 = vector.multi_reduction <add>, %10, %cst_6 [1] : vector<8x128xf32> to vector<8xf32>
    %12 = vector.shape_cast %11 : vector<8xf32> to vector<8x1xf32>
    %13 = vector.broadcast %12 : vector<8x1xf32> to vector<8x128xf32>
    %14 = arith.divf %10, %13 : vector<8x128xf32>
    %c0_7 = arith.constant 0 : index
    %c0_8 = arith.constant 0 : index
    %15 = vector.load %arg4[%c0_7, %c0_8] : memref<8x128xf32, #tpu.memory_space<vmem>>, vector<8x128xf32>
    tpu.vector_store %arg4[%c0_7, %c0_8], %14 {strides = array<i32>} : memref<8x128xf32, #tpu.memory_space<vmem>>, vector<8x128xf32>,
    return
  }
  func.func @transform_0(%arg0: i32) -> (i32, i32) {
    %c0_i32 = arith.constant 0 : i32
    %c0_i32_0 = arith.constant 0 : i32
    return %arg0, %c0_i32 : i32, i32
  }
  func.func @transform_1(%arg0: i32) -> (i32, i32) {
    %c0_i32 = arith.constant 0 : i32
    %c0_i32_0 = arith.constant 0 : i32
    %c0_i32_1 = arith.constant 0 : i32
    return %c0_i32, %c0_i32_0 : i32, i32
  }
  func.func @transform_2(%arg0: i32) -> (i32, i32) {
    %c0_i32 = arith.constant 0 : i32
    %c0_i32_0 = arith.constant 0 : i32
    %c0_i32_1 = arith.constant 0 : i32
    return %c0_i32, %c0_i32_0 : i32, i32
  }
  func.func @transform_3(%arg0: i32) -> (i32, i32) {
    %c0_i32 = arith.constant 0 : i32
    %c0_i32_0 = arith.constant 0 : i32
    return %arg0, %c0_i32 : i32, i32
  }
}

</mosaic_0001>

<bundles_post_ra>
// kernel: tpu_custom_call.1
= control target key start
LH: loop header
LB: loop body
LE: loop exit
PB: predicated region body
PF: predicated region fallthrough
CT: control target
= control target key end

     0   :  { %8 = vsyncpa [#allocation3], 0  ;;  %s382_s0 = inlined_call_operand.hbm [shape: bf16[8,128], index: 0, kind: input, shape index: {}]   ;;  %s383_s1 = inlined_call_operand.hbm [shape: bf16[128,128], index: 1, kind: input, shape index: {}]   ;;  %s384_s2 = inlined_call_operand.vmem [shape: f32[1,128], index: 2, kind: input, shape index: {}]   ;;  %s385_s3 = inlined_call_operand.hbm [shape: f32[8,128], index: 3, kind: output, shape index: {}]  }
   0x1   :  { %9 = vsyncpa [#allocation6], 0 }
   0x2   :  { %10 = vsyncpa [#allocation4], 0  ;;  %s309_s12 = smov [#allocation2]   ;;  %s310_s14 = smov [#allocation5]  }
   0x3   :  { %s17_s13 = sshll.u32 %s309_s12, 4  ;;  %s26_s15 = sshll.u32 %s310_s14, 4  ;;  %s18_s13 = int_to_ptr.vmem [resolvable:$true] %s17_s13  ;;  %s336_s15 = int_to_ptr.vmem [resolvable:$true] %s26_s15 }
   0x4   :  { %s237_s18 = scalar_lea.hbm %s382_s0, 64 }
   0x5   :  { %p238_p0 = scmp.ne.s32.totalorder %s382_s0, %s237_s18  ;;  %p241_p1 = scmp.lt.u32.totalorder %s237_s18, %s382_s0 }
   0x7   :  { %p243_p2 = pnand %p241_p1, %p238_p0 }
   0x9   :  { %246 = shalt.err (!%p243_p2)
}
   0xa   :  { %s247_s23 = scalar_lea.vmem %s18_s13, 64  ;;  %p252_p4 = scmp.lt.s32.totalorder %s18_s13, %s18_s13 }
   0xb   :  { %p248_p3 = scmp.ne.s32.totalorder %s18_s13, %s247_s23  ;;  %p253_p5 = scmp.lt.s32.totalorder %s247_s23, %s247_s23 }
   0xd   :  { %p254_p6 = por %p253_p5, %p252_p4 }
   0xf   :  { %p255_p7 = pnand %p254_p6, %p248_p3 }
  0x11   :  { %258 = shalt.err (!%p255_p7)
}
  0x12   :  { %20 = dma.hbm_to_vmem [thread:$0]  %s382_s0, 64, %s18_s13, [#allocation3]  }
  0x13   :  { %s259_s28 = scalar_lea.hbm %s383_s1, 1024 }
  0x14   :  { %p260_p8 = scmp.ne.s32.totalorder %s383_s1, %s259_s28  ;;  %p263_p9 = scmp.lt.u32.totalorder %s259_s28, %s383_s1 }
  0x16   :  { %p265_p10 = pnand %p263_p9, %p260_p8 }
  0x18   :  { %268 = shalt.err (!%p265_p10)
}
  0x19   :  { %s269_s6 = scalar_lea.vmem %s336_s15, 1024  ;;  %p274_p12 = scmp.lt.s32.totalorder %s336_s15, %s336_s15 }
  0x1a   :  { %p270_p11 = scmp.ne.s32.totalorder %s336_s15, %s269_s6  ;;  %p275_p13 = scmp.lt.s32.totalorder %s269_s6, %s269_s6 }
  0x1c   :  { %p276_p0 = por %p275_p13, %p274_p12 }
  0x1e   :  { %p277_p1 = pnand %p276_p0, %p270_p11 }
  0x20   :  { %280 = shalt.err (!%p277_p1)
}
  0x21   :  { %s311_s0 = smov 64   ;;  %s312_s7 = smov 4  }
  0x22   :  { %32 = dma.hbm_to_vmem [thread:$0]  %s383_s1, 1024, %s336_s15, [#allocation6], %s311_s0, %s311_s0, %s312_s7  }
  0x23   :  { %303 = dma.done.wait [#allocation3], 64  }
  0x24   :  { %304 = vsyncadd [#allocation3], 4294967232 }
  0x25   :  { %305 = dma.done.wait [#allocation6], 1024  }
  0x26   :  { %306 = vsyncadd [#allocation6], 4294966272  ;;  %v313_v0 = vmov 0.0   ;;  %vm314_vm0 = vmmov 0   ;;  %v225_v1 = vld [vmem:[#allocation5] sm:$0xff]   ;;  %v226_v2 = vld [vmem:[#allocation5 + $0x8] sm:$0xff]  }
  0x27   :  { %198 = vmatprep.subr.bf16.mxu0 %v313_v0  ;;  %214 = vmatprep.mubr.msk.bf16.mxu0 %vm314_vm0, %v313_v0  ;;  %v227_v3 = vld [vmem:[#allocation5 + $0x10] sm:$0xff]   ;;  %v228_v4 = vld [vmem:[#allocation5 + $0x18] sm:$0xff]   ;;  %v229_v5 = vld [vmem:[#allocation5 + $0x20] sm:$0xff]   ;;  %s315_s11 = smov [#allocation7]  }
  0x28   :  { %199 = vmatpush3.bf16.msra.mxu0 %v225_v1  ;;  %v230_v6 = vld [vmem:[#allocation5 + $0x28] sm:$0xff]   ;;  %v231_v7 = vld [vmem:[#allocation5 + $0x30] sm:$0xff]   ;;  %v232_v8 = vld [vmem:[#allocation5 + $0x38] sm:$0xff]   ;;  %s170_s12 = sshll.u32 %s315_s11, 4  ;;  %s171_s12 = int_to_ptr.vmem [resolvable:$true] %s170_s12 }
  0x29   :  { %200 = vmatprep.subr.bf16.mxu0 %v313_v0  ;;  %v42_v9 = vld [vmem:[#allocation2] sm:$0xf]  ;;  %p286_p3 = scmp.lt.s32.totalorder %s171_s12, %s171_s12 }
  0x2a   :  { %v180_v10 = vld [vmem:[%s384_s2] ss:$0 sm:$0xff]  ;;  %s281_s2 = scalar_lea.vmem %s171_s12, 128 }
  0x2b   :  { %p282_p2 = scmp.ne.s32.totalorder %s171_s12, %s281_s2  ;;  %p287_p4 = scmp.lt.s32.totalorder %s281_s2, %s281_s2 }
  0x2c   :  { %201 = vmatpush3.bf16.msra.mxu0 %v226_v2 }
  0x2d   :  { %202 = vmatprep.subr.bf16.mxu0 %v313_v0  ;;  %p288_p5 = por %p287_p4, %p286_p3 }
  0x2f   :  { %p289_p6 = pnand %p288_p5, %p282_p2 }
  0x30   :  { %203 = vmatpush3.bf16.msra.mxu0 %v227_v3 }
  0x31   :  { %204 = vmatprep.subr.bf16.mxu0 %v313_v0 }
  0x34   :  { %205 = vmatpush3.bf16.msra.mxu0 %v228_v4 }
  0x35   :  { %206 = vmatprep.subr.bf16.mxu0 %v313_v0 }
  0x38   :  { %207 = vmatpush3.bf16.msra.mxu0 %v229_v5 }
  0x39   :  { %208 = vmatprep.subr.bf16.mxu0 %v313_v0 }
  0x3c   :  { %209 = vmatpush3.bf16.msra.mxu0 %v230_v6 }
  0x3d   :  { %210 = vmatprep.subr.bf16.mxu0 %v313_v0 }
  0x40   :  { %211 = vmatpush3.bf16.msra.mxu0 %v231_v7 }
  0x41   :  { %212 = vmatprep.subr.bf16.mxu0 %v313_v0 }
  0x44   :  { %213 = vmatpush3.bf16.msra.mxu0 %v232_v8 }
  0x47   :  { %215 = vmatmul.mubr.bf16.vlgmr.msra.gmra.mrb[0].mxu0 %v42_v9 }
 0x11a   :  { %v148_v11 = vpop.f32.mrb[0].mxu0 }
 0x11b   :  { %v149_v12 = vadd.f32 %v180_v10, %v148_v11  ;;  %v216_v13 = vpop.f32.mrb[1].mxu0 }
 0x11c   :  { %v151_v14 = vpop.f32.mrb[2].mxu0 }
 0x11d   :  { %154 = vmax.xlane.f32.xlu0 %v149_v12  ;;  %v217_v15 = vpop.f32.mrb[3].mxu0 }
 0x1aa   :  { %v155_v16 = vpop.xlane.xlu0 %154 }
 0x1ab   :  { %v156_v17 = vsub.f32 %v149_v12, %v155_v16 }
 0x1ad   :  { %v157_v18 = vmul.f32 1.442695, %v156_v17 }
 0x1af   :  { %233 = vpow2.f32 %v157_v18 }
 0x1b9   :  { %v234_v19 = vpop.eup %233 }
 0x1ba   :  { %159 = vadd.xlane.f32.xlu0 %v234_v19 }
 0x247   :  { %v160_v20 = vpop.xlane.xlu0 %159 }
 0x248   :  { %235 = vrcp.f32 %v160_v20 }
 0x252   :  { %v236_v21 = vpop.eup %235 }
 0x253   :  { %v162_v22 = vmul.f32 %v236_v21, %v234_v19 }
 0x255   :  { %163 = vst [vmem:[#allocation7] sm:$0xff] %v162_v22 }
 0x256   :  { %292 = shalt.err (!%p289_p6)
}
 0x257   :  { %s293_s15 = scalar_lea.hbm %s385_s3, 128 }
 0x258   :  { %p294_p7 = scmp.ne.s32.totalorder %s385_s3, %s293_s15  ;;  %p297_p8 = scmp.lt.u32.totalorder %s293_s15, %s385_s3 }
 0x25a   :  { %p299_p9 = pnand %p297_p8, %p294_p7 }
 0x25c   :  { %302 = shalt.err (!%p299_p9)
}
 0x25d   :  { %173 = dma.vmem_to_hbm [thread:$0]  %s171_s12, 128, %s385_s3, [#allocation4]  }
 0x25e   :  { %307 = dma.done.wait [#allocation4], 128  }
 0x25f   :  { %308 = vsyncadd [#allocation4], 4294967168 }
 0x260   :  { %177 = vsyncpa [#allocation3], 1 }
 0x261   :  { %178 = vsyncpa [#allocation6], 1 }
 0x262   :  { %179 = vsyncpa [#allocation4], 1 }

</bundles_post_ra>
